<compile_context>
chip_gen: v7x
topology: tpu7x:2x2x1
jax: 0.10.0
libtpu: 0.0.40
codegen_flags: <defaults>
</compile_context>

<pallas_src>
import functools

import jax
import jax.numpy as jnp
import numpy as np
from jax.experimental import pallas as pl
from jax.experimental.pallas import tpu as pltpu


def _vmem_limit_bytes():
    # v5e/v6e: 128 MiB physical -> 64 MiB scoped is fine.
    # v7x: only 64 MiB physical -> leave headroom (<=48 MiB).
    try:
        cap = pltpu.get_tpu_info().vmem_capacity_bytes
        return int(min(64 * 1024 * 1024, (cap * 3) // 4))
    except Exception:
        return 48 * 1024 * 1024


_VMEM_LIMIT = _vmem_limit_bytes()


# ---------------------------------------------------------------------------
# Tiled GEMM kernels (bf16 operands, f32 accumulation, fused epilogue)
# ---------------------------------------------------------------------------
def _gemm_bias_kernel(a_ref, w_ref, b_ref, o_ref, acc_ref, *, relu):
    @pl.when(pl.program_id(2) == 0)
    def _():
        acc_ref[...] = jnp.zeros_like(acc_ref)

    acc_ref[...] += jnp.dot(a_ref[...], w_ref[...],
                            preferred_element_type=jnp.float32)

    @pl.when(pl.program_id(2) == pl.num_programs(2) - 1)
    def _():
        out = acc_ref[...] + b_ref[...]            # f32 epilogue
        if relu:
            out = jnp.maximum(out, 0.0)
        o_ref[...] = out.astype(o_ref.dtype)


def _gemm_bias_res_relu_kernel(a_ref, w_ref, b_ref, r_ref, o_ref, acc_ref):
    @pl.when(pl.program_id(2) == 0)
    def _():
        acc_ref[...] = jnp.zeros_like(acc_ref)

    acc_ref[...] += jnp.dot(a_ref[...], w_ref[...],
                            preferred_element_type=jnp.float32)

    @pl.when(pl.program_id(2) == pl.num_programs(2) - 1)
    def _():
        out = acc_ref[...] + b_ref[...] + r_ref[...].astype(jnp.float32)
        o_ref[...] = jnp.maximum(out, 0.0).astype(o_ref.dtype)


def _round_up(x, m):
    return ((x + m - 1) // m) * m


def _pick_tile(dim, unit, max_tile):
    """Pad `dim` to a multiple of `unit`; pick the largest tile that is a
    multiple of `unit`, divides the padded dim, and is <= max_tile."""
    padded = _round_up(dim, unit)
    q = padded // unit
    best = 1
    for d in range(1, max_tile // unit + 1):
        if q % d == 0:
            best = d
    return best * unit, padded


def pallas_matmul_bias(a, w, b, *, relu=False, residual=None,
                       out_dtype=jnp.bfloat16):
    """out = [relu]( a @ w + b [+ residual] ), tiled Pallas GEMM pipeline."""
    M, K = a.shape
    K2, N = w.shape
    assert K == K2

    tm, Mp = _pick_tile(M, 8, 256)
    tn, Np = _pick_tile(N, 128, 256)
    tk, Kp = _pick_tile(K, 128, 512)

    a_p = jnp.pad(a.astype(jnp.bfloat16), ((0, Mp - M), (0, Kp - K)))
    w_p = jnp.pad(w.astype(jnp.bfloat16), ((0, Kp - K), (0, Np - N)))
    b_p = jnp.pad(b.reshape(1, N).astype(jnp.float32), ((0, 0), (0, Np - N)))

    in_specs = [
        pl.BlockSpec((tm, tk), lambda i, j, k: (i, k)),
        pl.BlockSpec((tk, tn), lambda i, j, k: (k, j)),
        pl.BlockSpec((1, tn), lambda i, j, k: (0, j)),
    ]
    args = [a_p, w_p, b_p]

    if residual is None:
        kernel = functools.partial(_gemm_bias_kernel, relu=relu)
    else:
        r_p = jnp.pad(residual.astype(jnp.bfloat16),
                      ((0, Mp - M), (0, Np - N)))
        in_specs.append(pl.BlockSpec((tm, tn), lambda i, j, k: (i, j)))
        args.append(r_p)
        kernel = _gemm_bias_res_relu_kernel

    bytes_accessed = int(sum(x.size * x.dtype.itemsize for x in args)
                         + Mp * Np * jnp.dtype(out_dtype).itemsize)

    out = pl.pallas_call(
        kernel,
        out_shape=jax.ShapeDtypeStruct((Mp, Np), out_dtype),
        grid=(Mp // tm, Np // tn, Kp // tk),
        in_specs=in_specs,
        out_specs=pl.BlockSpec((tm, tn), lambda i, j, k: (i, j)),
        scratch_shapes=[pltpu.VMEM((tm, tn), jnp.float32)],
        compiler_params=pltpu.CompilerParams(
            dimension_semantics=("parallel", "parallel", "arbitrary"),
            vmem_limit_bytes=_VMEM_LIMIT),
        cost_estimate=pl.CostEstimate(
            flops=2 * Mp * Np * Kp, transcendentals=0,
            bytes_accessed=bytes_accessed),
    )(*args)
    return out[:M, :N]


# ---------------------------------------------------------------------------
# Fused classifier head (avgpool + linear1 + ReLU + dropout(eval) + linear2)
# ---------------------------------------------------------------------------
def _head_kernel(f_ref, w1_ref, b1_ref, w2_ref, b2_ref, o_ref):
    # AdaptiveAvgPool2d((1,1)) == mean over the spatial axis (channels-last).
    pooled = jnp.mean(f_ref[...].astype(jnp.float32), axis=1)         # (B, C)
    h = jnp.dot(pooled, w1_ref[...], preferred_element_type=jnp.float32)
    h = jnp.maximum(h + b1_ref[...], 0.0)                             # ReLU
    # TODO(synk): nn.Dropout(p=0.5) is identity at inference time; omitted.
    o = jnp.dot(h, w2_ref[...], preferred_element_type=jnp.float32) + b2_ref[...]
    o_ref[...] = o.astype(o_ref.dtype)


def _full_specs(*arrays):
    return [pl.BlockSpec(a.shape, lambda i, nd=a.ndim: (0,) * nd) for a in arrays]


def pallas_head(feat_nhwc, w1, b1, w2, b2):
    B, H, W, C = feat_nhwc.shape
    f = feat_nhwc.reshape(B, H * W, C)        # channels-last: free reshape
    args = (f, w1, b1.reshape(1, -1), w2, b2.reshape(1, -1))
    classes = w2.shape[1]
    return pl.pallas_call(
        _head_kernel,
        out_shape=jax.ShapeDtypeStruct((B, classes), jnp.float32),
        grid=(1,),
        in_specs=_full_specs(*args),
        out_specs=pl.BlockSpec((B, classes), lambda i: (0, 0)),
        compiler_params=pltpu.CompilerParams(vmem_limit_bytes=_VMEM_LIMIT),
    )(*args)


# ---------------------------------------------------------------------------
# Convolution = channels-last im2col (JAX glue) + tiled Pallas GEMM
# ---------------------------------------------------------------------------
def _im2col_nhwc(x, kh, kw, stride, padding):
    # TODO(synk): form the kh*kw patches inside the Pallas kernel (shifted VMEM
    # views per tap) to avoid materializing the 9x-inflated matrix in HBM.
    B, H, W, C = x.shape
    xp = jnp.pad(x, ((0, 0), (padding, padding), (padding, padding), (0, 0)))
    OH = (H + 2 * padding - kh) // stride + 1
    OW = (W + 2 * padding - kw) // stride + 1
    cols = []
    for i in range(kh):
        for j in range(kw):
            cols.append(xp[:, i:i + stride * OH:stride,
                           j:j + stride * OW:stride, :])
    col = jnp.stack(cols, axis=3)                # (B, OH, OW, kh*kw, C)
    return col.reshape(B * OH * OW, kh * kw * C), OH, OW


def conv2d_pallas(x, w, b, stride, padding, *, relu=False, residual=None):
    """x: NHWC (bf16), w: OIHW (torch convention), b folded BN bias. -> NHWC bf16."""
    B, H, W, C = x.shape
    O, Ci, kh, kw = w.shape
    if kh == 1 and kw == 1 and padding == 0:
        xs = x[:, ::stride, ::stride, :]
        OH, OW = xs.shape[1], xs.shape[2]
        a = xs.reshape(B * OH * OW, C)
    else:
        a, OH, OW = _im2col_nhwc(x, kh, kw, stride, padding)
    # (O,C,kh,kw) -> (kh,kw,C,O) -> (kh*kw*C, O): matches im2col feature order.
    w2 = w.transpose(2, 3, 1, 0).reshape(kh * kw * Ci, O)
    res2 = None
    if residual is not None:
        res2 = residual.reshape(B * OH * OW, O)   # already channels-last
    out = pallas_matmul_bias(a, w2, b, relu=relu, residual=res2)
    return out.reshape(B, OH, OW, O)


def maxpool2d_nhwc(x, k=3, s=2, p=1):
    # TODO(synk): stem 3x3/stride-2 max-pool kept in plain JAX (reduce_window),
    # but now on the channels-last layout; could be fused into a Pallas kernel.
    init = jnp.array(-jnp.inf, dtype=x.dtype)
    return jax.lax.reduce_window(
        x, init, jax.lax.max,
        (1, k, k, 1), (1, s, s, 1),
        [(0, 0), (p, p), (p, p), (0, 0)])


# ---------------------------------------------------------------------------
# Deterministic parameter init (resnet18 shapes), BN folded (eval mode)
# ---------------------------------------------------------------------------
def _fold_bn(w, gamma, beta, mean, var, eps=1e-5):
    scale = gamma / jnp.sqrt(var + eps)
    return w * scale[:, None, None, None], beta - mean * scale


def _conv_bn_params(key, out_c, in_c, k):
    kw_, kg, kb, km, kv = jax.random.split(key, 5)
    w = jax.random.normal(kw_, (out_c, in_c, k, k), jnp.float32) * np.sqrt(2.0 / (in_c * k * k))
    gamma = jax.random.uniform(kg, (out_c,), jnp.float32, 0.8, 1.2)
    beta = 0.1 * jax.random.normal(kb, (out_c,), jnp.float32)
    mean = 0.1 * jax.random.normal(km, (out_c,), jnp.float32)
    var = jax.random.uniform(kv, (out_c,), jnp.float32, 0.8, 1.2)
    return _fold_bn(w, gamma, beta, mean, var)


def init_params(key, hidden_dim=64, classes=2):
    keys = iter(jax.random.split(key, 64))
    p = {'stem': _conv_bn_params(next(keys), 64, 3, 7), 'layers': []}
    stages = [(64, 64, 1), (64, 128, 2), (128, 256, 2), (256, 512, 2)]
    for in_c, out_c, stride in stages:
        blocks = []
        for bi in range(2):
            s = stride if bi == 0 else 1
            cin = in_c if bi == 0 else out_c
            blk = {
                'stride': s,
                'conv1': _conv_bn_params(next(keys), out_c, cin, 3),
                'conv2': _conv_bn_params(next(keys), out_c, out_c, 3),
                'down': (_conv_bn_params(next(keys), out_c, cin, 1)
                         if (bi == 0 and (s != 1 or cin != out_c)) else None),
            }
            blocks.append(blk)
        p['layers'].append(blocks)
    k1, k2, k3, k4 = jax.random.split(next(keys), 4)
    dim_feats = 512  # resnet18 last_linear.in_features
    p['w1'] = jax.random.normal(k1, (dim_feats, hidden_dim), jnp.float32) * np.sqrt(2.0 / dim_feats)
    p['b1'] = 0.01 * jax.random.normal(k2, (hidden_dim,), jnp.float32)
    p['w2'] = jax.random.normal(k3, (hidden_dim, classes), jnp.float32) * np.sqrt(2.0 / hidden_dim)
    p['b2'] = 0.01 * jax.random.normal(k4, (classes,), jnp.float32)
    return p


# ---------------------------------------------------------------------------
# Forward pass (Pallas) and pure-JAX reference (same bf16 mixed precision)
# ---------------------------------------------------------------------------
def _basic_block(x, blk):
    if blk['down'] is not None:
        dw, db = blk['down']
        identity = conv2d_pallas(x, dw, db, blk['stride'], 0)
    else:
        identity = x
    w1, b1 = blk['conv1']
    out = conv2d_pallas(x, w1, b1, blk['stride'], 1, relu=True)
    w2, b2 = blk['conv2']
    # residual add + final ReLU fused into the Pallas GEMM epilogue
    return conv2d_pallas(out, w2, b2, 1, 1, residual=identity)


def godmodel_forward(params, x_nchw):
    # Convert to channels-last bf16 exactly once at the model boundary.
    x = x_nchw.transpose(0, 2, 3, 1).astype(jnp.bfloat16)
    w, b = params['stem']
    x = conv2d_pallas(x, w, b, 2, 3, relu=True)
    x = maxpool2d_nhwc(x)
    for blocks in params['layers']:
        for blk in blocks:
            x = _basic_block(x, blk)
    return pallas_head(x, params['w1'], params['b1'], params['w2'], params['b2'])


def _conv_ref(x_nhwc, w_oihw, b, stride, padding):
    w_hwio = w_oihw.transpose(2, 3, 1, 0).astype(jnp.bfloat16)
    y = jax.lax.conv_general_dilated(
        x_nhwc.astype(jnp.bfloat16), w_hwio, (stride, stride),
        [(padding, padding)] * 2,
        dimension_numbers=('NHWC', 'HWIO', 'NHWC'),
        preferred_element_type=jnp.float32)
    return y + b[None, None, None, :]


def godmodel_forward_ref(params, x_nchw):
    # Same mixed precision as the Pallas path: bf16 operands/activations,
    # f32 accumulation and epilogue.
    x = x_nchw.transpose(0, 2, 3, 1).astype(jnp.bfloat16)
    w, b = params['stem']
    x = jnp.maximum(_conv_ref(x, w, b, 2, 3), 0.0).astype(jnp.bfloat16)
    x = maxpool2d_nhwc(x)
    for blocks in params['layers']:
        for blk in blocks:
            if blk['down'] is not None:
                dw, db = blk['down']
                identity = _conv_ref(x, dw, db, blk['stride'], 0).astype(jnp.bfloat16)
            else:
                identity = x
            w1, b1 = blk['conv1']
            out = jnp.maximum(_conv_ref(x, w1, b1, blk['stride'], 1), 0.0).astype(jnp.bfloat16)
            w2, b2 = blk['conv2']
            x = jnp.maximum(_conv_ref(out, w2, b2, 1, 1)
                            + identity.astype(jnp.float32), 0.0).astype(jnp.bfloat16)
    pooled = jnp.mean(x.astype(jnp.float32), axis=(1, 2))
    h = jnp.maximum(pooled @ params['w1'] + params['b1'], 0.0)
    return h @ params['w2'] + params['b2']


if __name__ == "__main__":
    key = jax.random.PRNGKey(0)
    pkey, xkey = jax.random.split(key)
    params = init_params(pkey, hidden_dim=64, classes=2)
    x = jax.random.normal(xkey, (2, 3, 16, 16), jnp.float32)  # NCHW, 3-channel image

    out = godmodel_forward(params, x)
    out = jax.block_until_ready(out)
    assert out.shape == (2, 2), out.shape

    ref = godmodel_forward_ref(params, x)
    ref = jax.block_until_ready(ref)
    if not np.allclose(np.asarray(out), np.asarray(ref), rtol=1e-1, atol=5e-1):
        raise AssertionError(f"mismatch:\n{np.asarray(out)}\nvs ref\n{np.asarray(ref)}")

    print("KERNEL_OK")
</pallas_src>

<mosaic_0001>
module attributes {stable_mosaic.version = 11 : i64} {
  func.func @_gemm_bias_kernel(%arg0: i32, %arg1: i32, %arg2: i32, %arg3: memref<128x256xbf16, #tpu.memory_space<vmem>>, %arg4: memref<256x128xbf16, #tpu.memory_space<vmem>>, %arg5: memref<1x128xf32, #tpu.memory_space<vmem>>, %arg6: memref<128x128xbf16, #tpu.memory_space<vmem>>, %arg7: memref<128x128xf32, #tpu.memory_space<vmem>>) attributes {dimension_semantics = [#tpu.dimension_semantics<parallel>, #tpu.dimension_semantics<parallel>, #tpu.dimension_semantics<arbitrary>], iteration_bounds = array<i64: 1, 1, 1>, scalar_prefetch = 0 : i64, scratch_operands = 1 : i64, tpu.core_type = #tpu.core_type<tc>, window_params = [{transform_indices = @transform_0, window_bounds = array<i64: 128, 256>}, {transform_indices = @transform_1, window_bounds = array<i64: 256, 128>}, {transform_indices = @transform_2, window_bounds = array<i64: 1, 128>}, {transform_indices = @transform_3, window_bounds = array<i64: 128, 128>}]} {
    %c0_i32 = arith.constant 0 : i32
    %0 = arith.cmpi eq, %arg2, %c0_i32 : i32
    %1 = arith.extui %0 : i1 to i32
    %c0_i32_0 = arith.constant 0 : i32
    %2 = arith.cmpi ne, %1, %c0_i32_0 : i32
    scf.if %2 {
      %cst_10 = arith.constant 0.000000e+00 : f32
      %12 = vector.broadcast %cst_10 : f32 to vector<128x128xf32>
      %c0_11 = arith.constant 0 : index
      %c0_12 = arith.constant 0 : index
      %13 = vector.load %arg7[%c0_11, %c0_12] : memref<128x128xf32, #tpu.memory_space<vmem>>, vector<128x128xf32>
      tpu.vector_store %arg7[%c0_11, %c0_12], %12 {strides = array<i32>} : memref<128x128xf32, #tpu.memory_space<vmem>>, vector<128x128xf32>,
    } else {
    }
    %c0 = arith.constant 0 : index
    %c0_1 = arith.constant 0 : index
    %3 = vector.load %arg7[%c0, %c0_1] : memref<128x128xf32, #tpu.memory_space<vmem>>, vector<128x128xf32>
    %c0_2 = arith.constant 0 : index
    %c0_3 = arith.constant 0 : index
    %4 = vector.load %arg3[%c0_2, %c0_3] : memref<128x256xbf16, #tpu.memory_space<vmem>>, vector<128x256xbf16>
    %c0_4 = arith.constant 0 : index
    %c0_5 = arith.constant 0 : index
    %5 = vector.load %arg4[%c0_4, %c0_5] : memref<256x128xbf16, #tpu.memory_space<vmem>>, vector<256x128xbf16>
    %cst = arith.constant dense<0.000000e+00> : vector<128x128xf32>
    %6 = tpu.matmul %4, %5, %cst {dimension_numbers = #tpu.dot_dimension_numbers<[1], [0], [0], [1], [0, 0, 1, 1], [], []>} : vector<128x256xbf16>, vector<256x128xbf16>, vector<128x128xf32> -> vector<128x128xf32>
    %7 = arith.addf %3, %6 : vector<128x128xf32>
    %c0_6 = arith.constant 0 : index
    %c0_7 = arith.constant 0 : index
    %8 = vector.load %arg7[%c0_6, %c0_7] : memref<128x128xf32, #tpu.memory_space<vmem>>, vector<128x128xf32>
    tpu.vector_store %arg7[%c0_6, %c0_7], %7 {strides = array<i32>} : memref<128x128xf32, #tpu.memory_space<vmem>>, vector<128x128xf32>,
    %c0_i32_8 = arith.constant 0 : i32
    %9 = arith.cmpi eq, %arg2, %c0_i32_8 : i32
    %10 = arith.extui %9 : i1 to i32
    %c0_i32_9 = arith.constant 0 : i32
    %11 = arith.cmpi ne, %10, %c0_i32_9 : i32
    scf.if %11 {
      %c0_10 = arith.constant 0 : index
      %c0_11 = arith.constant 0 : index
      %12 = vector.load %arg7[%c0_10, %c0_11] : memref<128x128xf32, #tpu.memory_space<vmem>>, vector<128x128xf32>
      %c0_12 = arith.constant 0 : index
      %c0_13 = arith.constant 0 : index
      %13 = vector.load %arg5[%c0_12, %c0_13] : memref<1x128xf32, #tpu.memory_space<vmem>>, vector<1x128xf32>
      %14 = vector.broadcast %13 : vector<1x128xf32> to vector<128x128xf32>
      %15 = arith.addf %12, %14 : vector<128x128xf32>
      %cst_14 = arith.constant 0.000000e+00 : f32
      %16 = vector.broadcast %cst_14 : f32 to vector<128x128xf32>
      %17 = arith.maximumf %15, %16 : vector<128x128xf32>
      %18 = arith.truncf %17 : vector<128x128xf32> to vector<128x128xbf16>
      %c0_15 = arith.constant 0 : index
      %c0_16 = arith.constant 0 : index
      %19 = vector.load %arg6[%c0_15, %c0_16] : memref<128x128xbf16, #tpu.memory_space<vmem>>, vector<128x128xbf16>
      tpu.vector_store %arg6[%c0_15, %c0_16], %18 {strides = array<i32>} : memref<128x128xbf16, #tpu.memory_space<vmem>>, vector<128x128xbf16>,
    } else {
    }
    return
  }
  func.func @transform_0(%arg0: i32, %arg1: i32, %arg2: i32) -> (i32, i32) {
    %c0_i32 = arith.constant 0 : i32
    return %arg0, %arg2 : i32, i32
  }
  func.func @transform_1(%arg0: i32, %arg1: i32, %arg2: i32) -> (i32, i32) {
    %c0_i32 = arith.constant 0 : i32
    return %arg2, %arg1 : i32, i32
  }
  func.func @transform_2(%arg0: i32, %arg1: i32, %arg2: i32) -> (i32, i32) {
    %c0_i32 = arith.constant 0 : i32
    %c0_i32_0 = arith.constant 0 : i32
    return %c0_i32, %arg1 : i32, i32
  }
  func.func @transform_3(%arg0: i32, %arg1: i32, %arg2: i32) -> (i32, i32) {
    %c0_i32 = arith.constant 0 : i32
    return %arg0, %arg1 : i32, i32
  }
}

</mosaic_0001>

<bundles_post_ra>
// kernel: tpu_custom_call.1
= control target key start
LH: loop header
LB: loop body
LE: loop exit
PB: predicated region body
PF: predicated region fallthrough
CT: control target
= control target key end

     0   :  { %8 = vsyncpa [#allocation4], 0  ;;  %s990_s0 = inlined_call_operand.hbm [shape: bf16[128,256], index: 0, kind: input, shape index: {}]   ;;  %s991_s1 = inlined_call_operand.hbm [shape: bf16[256,128], index: 1, kind: input, shape index: {}]   ;;  %s992_s2 = inlined_call_operand.vmem [shape: f32[1,128], index: 2, kind: input, shape index: {}]   ;;  %s993_s3 = inlined_call_operand.hbm [shape: bf16[128,128], index: 3, kind: output, shape index: {}]  }
   0x1   :  { %9 = vsyncpa [#allocation7], 0 }
   0x2   :  { %10 = vsyncpa [#allocation5], 0  ;;  %s900_s12 = smov [#allocation3]   ;;  %s828_s16 = scalar_lea.hbm %s990_s0, 2048 }
   0x3   :  { %s16_s13 = sshll.u32 %s900_s12, 4  ;;  %p829_p0 = scmp.ne.s32.totalorder %s990_s0, %s828_s16  ;;  %s17_s13 = int_to_ptr.vmem [resolvable:$true] %s16_s13 }
   0x4   :  { %p832_p1 = scmp.lt.u32.totalorder %s828_s16, %s990_s0 }
   0x6   :  { %p834_p2 = pnand %p832_p1, %p829_p0 }
   0x8   :  { %837 = shalt.err (!%p834_p2)
}
   0x9   :  { %s838_s21 = scalar_lea.vmem %s17_s13, 2048  ;;  %p843_p4 = scmp.lt.s32.totalorder %s17_s13, %s17_s13 }
   0xa   :  { %p839_p3 = scmp.ne.s32.totalorder %s17_s13, %s838_s21  ;;  %p844_p5 = scmp.lt.s32.totalorder %s838_s21, %s838_s21 }
   0xc   :  { %p845_p6 = por %p844_p5, %p843_p4 }
   0xe   :  { %p846_p7 = pnand %p845_p6, %p839_p3 }
  0x10   :  { %849 = shalt.err (!%p846_p7)
}
  0x11   :  { %s901_s22 = smov 128   ;;  %s902_s23 = smov 8  }
  0x12   :  { %22 = dma.hbm_to_vmem [thread:$0]  %s990_s0, 2048, %s17_s13, [#allocation4], %s901_s22, %s901_s22, %s902_s23  }
  0x13   :  { %s903_s26 = smov [#allocation6]   ;;  %s850_s30 = scalar_lea.hbm %s991_s1, 2048 }
  0x14   :  { %s28_s27 = sshll.u32 %s903_s26, 4  ;;  %p851_p8 = scmp.ne.s32.totalorder %s991_s1, %s850_s30  ;;  %s29_s27 = int_to_ptr.vmem [resolvable:$true] %s28_s27 }
  0x15   :  { %p854_p9 = scmp.lt.u32.totalorder %s850_s30, %s991_s1 }
  0x17   :  { %p856_p10 = pnand %p854_p9, %p851_p8 }
  0x19   :  { %859 = shalt.err (!%p856_p10)
}
  0x1a   :  { %s860_s8 = scalar_lea.vmem %s29_s27, 2048  ;;  %p865_p12 = scmp.lt.s32.totalorder %s29_s27, %s29_s27 }
  0x1b   :  { %p861_p11 = scmp.ne.s32.totalorder %s29_s27, %s860_s8  ;;  %p866_p13 = scmp.lt.s32.totalorder %s860_s8, %s860_s8 }
  0x1d   :  { %p867_p0 = por %p866_p13, %p865_p12 }
  0x1f   :  { %p868_p1 = pnand %p867_p0, %p861_p11 }
  0x21   :  { %871 = shalt.err (!%p868_p1)
}
  0x22   :  { %s904_s0 = smov 64   ;;  %s905_s9 = smov 4  }
  0x23   :  { %34 = dma.hbm_to_vmem [thread:$0]  %s991_s1, 2048, %s29_s27, [#allocation7], %s904_s0, %s904_s0, %s905_s9  }
  0x24   :  { %894 = dma.done.wait [#allocation4], 2048  }
  0x25   :  { %895 = vsyncadd [#allocation4], 4294965248 }
  0x26   :  { %896 = dma.done.wait [#allocation7], 2048  }
  0x27   :  { %897 = vsyncadd [#allocation7], 4294965248  ;;  %v788_v0 = vld [vmem:[#allocation6 + $0x40] sm:$0xff]   ;;  %v790_v2 = vld [vmem:[#allocation6 + $0x48] sm:$0xff]  }
  0x28   :  { %v789_v1 = vld [vmem:[#allocation6] sm:$0xff]   ;;  %701 = vmatprep.subr.bf16.mxu0 %v788_v0  ;;  %765 = vmatprep.subr.bf16.mxu1 %v788_v0  ;;  %v791_v3 = vld [vmem:[#allocation6 + $0x8] sm:$0xff]   ;;  %v792_v4 = vld [vmem:[#allocation6 + $0x50] sm:$0xff]  }
  0x29   :  { %702 = vmatpush3.bf16.msra.mxu0 %v789_v1  ;;  %773 = vmatpush3.bf16.msra.mxu1 %v789_v1  ;;  %v793_v5 = vld [vmem:[#allocation6 + $0x10] sm:$0xff]   ;;  %v794_v6 = vld [vmem:[#allocation6 + $0x58] sm:$0xff]   ;;  %v796_v8 = vld [vmem:[#allocation6 + $0x60] sm:$0xff]  }
  0x2a   :  { %703 = vmatprep.subr.bf16.mxu0 %v790_v2  ;;  %766 = vmatprep.subr.bf16.mxu1 %v790_v2  ;;  %v795_v7 = vld [vmem:[#allocation6 + $0x18] sm:$0xff]   ;;  %v797_v9 = vld [vmem:[#allocation6 + $0x20] sm:$0xff]   ;;  %v798_v10 = vld [vmem:[#allocation6 + $0x68] sm:$0xff]  }
  0x2b   :  { %v806_v11 = vld [vmem:[#allocation3 + $0x4] ss:$8 sps:$4 sm:$0xff]   ;;  %v800_v14 = vld [vmem:[#allocation6 + $0x70] sm:$0xff]   ;;  %v802_v16 = vld [vmem:[#allocation6 + $0x78] sm:$0xff]  }
  0x2c   :  { %v809_v12 = vld [vmem:[#allocation3 + $0x44] ss:$8 sps:$4 sm:$0xff]   ;;  %336 = vmatprep.mubr.bf16.mxu0 %v806_v11  ;;  %v801_v15 = vld [vmem:[#allocation6 + $0x30] sm:$0xff]   ;;  %v803_v17 = vld [vmem:[#allocation6 + $0x38] sm:$0xff]  }
  0x2d   :  { %704 = vmatpush3.bf16.msra.mxu0 %v791_v3  ;;  %774 = vmatpush3.bf16.msra.mxu1 %v791_v3  ;;  %v799_v13 = vld [vmem:[#allocation6 + $0x28] sm:$0xff]   ;;  %v810_v20 = vld [vmem:[#allocation3 + $0x14] ss:$8 sps:$4 sm:$0xff]   ;;  %v814_v22 = vld [vmem:[#allocation3 + $0x10] ss:$8 sps:$4 sm:$0xff]  }
  0x2e   :  { %705 = vmatprep.subr.bf16.mxu0 %v792_v4  ;;  %767 = vmatprep.subr.bf16.mxu1 %v792_v4  ;;  %v804_v18 = vld [vmem:[#allocation3] ss:$8 sps:$4 sm:$0xff]   ;;  %v812_v21 = vld [vmem:[#allocation3 + $0x54] ss:$8 sps:$4 sm:$0xff]   ;;  %v815_v23 = vld [vmem:[#allocation3 + $0x50] ss:$8 sps:$4 sm:$0xff]  }
  0x2f   :  { %368 = vmatprep.mubr.bf16.mxu1 %v809_v12  ;;  %v807_v19 = vld [vmem:[#allocation3 + $0x40] ss:$8 sps:$4 sm:$0xff]   ;;  %v816_v24 = vld [vmem:[#allocation3 + $0x24] ss:$8 sps:$4 sm:$0xff]   ;;  %v822_v28 = vld [vmem:[#allocation3 + $0x34] ss:$8 sps:$4 sm:$0xff]  }
  0x30   :  { %v818_v25 = vld [vmem:[#allocation3 + $0x64] ss:$8 sps:$4 sm:$0xff]   ;;  %v820_v26 = vld [vmem:[#allocation3 + $0x20] ss:$8 sps:$4 sm:$0xff]   ;;  %v824_v29 = vld [vmem:[#allocation3 + $0x74] ss:$8 sps:$4 sm:$0xff]  }
  0x31   :  { %706 = vmatpush3.bf16.msra.mxu0 %v793_v5  ;;  %775 = vmatpush3.bf16.msra.mxu1 %v793_v5  ;;  %v821_v27 = vld [vmem:[#allocation3 + $0x60] ss:$8 sps:$4 sm:$0xff]   ;;  %v826_v30 = vld [vmem:[#allocation3 + $0x30] ss:$8 sps:$4 sm:$0xff]  }
  0x32   :  { %707 = vmatprep.subr.bf16.mxu0 %v794_v6  ;;  %768 = vmatprep.subr.bf16.mxu1 %v794_v6  ;;  %v827_v31 = vld [vmem:[#allocation3 + $0x70] ss:$8 sps:$4 sm:$0xff]   ;;  %v957_v35 = vld [vmem:[%s992_s2] ss:$0 sm:$0xff]  ;;  %s906_s2 = smov [#allocation8]  }
  0x33   :  { %s576_s13 = sshll.u32 %s906_s2, 4  ;;  %s577_s13 = int_to_ptr.vmem [resolvable:$true] %s576_s13 }
  0x34   :  { %s872_s14 = scalar_lea.vmem %s577_s13, 1024  ;;  %p877_p3 = scmp.lt.s32.totalorder %s577_s13, %s577_s13 }
  0x35   :  { %708 = vmatpush3.bf16.msra.mxu0 %v795_v7  ;;  %776 = vmatpush3.bf16.msra.mxu1 %v795_v7  ;;  %p873_p2 = scmp.ne.s32.totalorder %s577_s13, %s872_s14  ;;  %p878_p4 = scmp.lt.s32.totalorder %s872_s14, %s872_s14 }
  0x36   :  { %709 = vmatprep.subr.bf16.mxu0 %v796_v8  ;;  %769 = vmatprep.subr.bf16.mxu1 %v796_v8 }
  0x37   :  { %p879_p5 = por %p878_p4, %p877_p3 }
  0x39   :  { %710 = vmatpush3.bf16.msra.mxu0 %v797_v9  ;;  %777 = vmatpush3.bf16.msra.mxu1 %v797_v9  ;;  %p880_p6 = pnand %p879_p5, %p873_p2 }
  0x3a   :  { %711 = vmatprep.subr.bf16.mxu0 %v798_v10  ;;  %770 = vmatprep.subr.bf16.mxu1 %v798_v10 }
  0x3d   :  { %712 = vmatpush3.bf16.msra.mxu0 %v799_v13  ;;  %778 = vmatpush3.bf16.msra.mxu1 %v799_v13 }
  0x3e   :  { %713 = vmatprep.subr.bf16.mxu0 %v800_v14  ;;  %771 = vmatprep.subr.bf16.mxu1 %v800_v14 }
  0x41   :  { %714 = vmatpush3.bf16.msra.mxu0 %v801_v15  ;;  %779 = vmatpush3.bf16.msra.mxu1 %v801_v15 }
  0x42   :  { %715 = vmatprep.subr.bf16.mxu0 %v802_v16  ;;  %772 = vmatprep.subr.bf16.mxu1 %v802_v16 }
  0x45   :  { %716 = vmatpush3.bf16.msra.mxu0 %v803_v17  ;;  %780 = vmatpush3.bf16.msra.mxu1 %v803_v17 }
  0x48   :  { %337 = vmatmul.mubr.bf16.vlgmr.msra.gmra.mrb[0].mxu0 %v804_v18  ;;  %369 = vmatmul.mubr.bf16.vlgmr.msra.gmra.mrb[0].mxu1 %v807_v19 }
  0x49   :  { %344 = vmatprep.mubr.bf16.mxu0 %v810_v20  ;;  %376 = vmatprep.mubr.bf16.mxu1 %v812_v21 }
  0x50   :  { %345 = vmatmul.mubr.bf16.gmra.mrb[4].mxu0 %v814_v22  ;;  %377 = vmatmul.mubr.bf16.gmra.mrb[4].mxu1 %v815_v23 }
  0x51   :  { %352 = vmatprep.mubr.bf16.mxu0 %v816_v24  ;;  %384 = vmatprep.mubr.bf16.mxu1 %v818_v25 }
  0x58   :  { %353 = vmatmul.mubr.bf16.gmra.mrb[8].mxu0 %v820_v26  ;;  %385 = vmatmul.mubr.bf16.gmra.mrb[8].mxu1 %v821_v27 }
  0x59   :  { %360 = vmatprep.mubr.bf16.mxu0 %v822_v28  ;;  %392 = vmatprep.mubr.bf16.mxu1 %v824_v29 }
  0x60   :  { %361 = vmatmul.mubr.bf16.gmra.mrb[12].mxu0 %v826_v30  ;;  %393 = vmatmul.mubr.bf16.gmra.mrb[12].mxu1 %v827_v31 }
 0x11b   :  { %v717_v32 = vpop.f32.mrb[0].mxu0  ;;  %v741_v33 = vpop.f32.mrb[0].mxu1 }
 0x11c   :  { %v718_v34 = vpop.f32.mrb[1].mxu0  ;;  %v742_v36 = vpop.f32.mrb[1].mxu1 }
 0x11d   :  { %v719_v37 = vadd.f32 %v718_v34, %v717_v32  ;;  %v743_v38 = vadd.f32 %v742_v36, %v741_v33  ;;  %v720_v39 = vpop.f32.mrb[2].mxu0  ;;  %v744_v40 = vpop.f32.mrb[2].mxu1 }
 0x11e   :  { %v721_v41 = vpop.f32.mrb[3].mxu0  ;;  %v745_v42 = vpop.f32.mrb[3].mxu1 }
 0x11f   :  { %v459_v43 = vadd.f32 %v719_v37, %v957_v35  ;;  %v467_v44 = vadd.f32 %v743_v38, %v957_v35  ;;  %v722_v45 = vadd.f32 %v721_v41, %v720_v39  ;;  %v746_v46 = vadd.f32 %v745_v42, %v744_v40 }
 0x121   :  { %v460_v47 = vadd.f32 %v722_v45, %v957_v35  ;;  %v468_v48 = vadd.f32 %v746_v46, %v957_v35  ;;  %v475_v49 = vmax.f32 %v459_v43, 0.0  ;;  %v483_v50 = vmax.f32 %v467_v44, 0.0 }
 0x123   :  { %v476_v51 = vmax.f32 %v460_v47, 0.0  ;;  %v484_v52 = vmax.f32 %v468_v48, 0.0  ;;  %v723_v53 = vpop.f32.mrb[4].mxu0  ;;  %v747_v54 = vpop.f32.mrb[4].mxu1 }
 0x124   :  { %v724_v55 = vpop.f32.mrb[5].mxu0  ;;  %v748_v56 = vpop.f32.mrb[5].mxu1 }
 0x125   :  { %v657_v57 = vpack.c.bf16 %v476_v51, %v475_v49  ;;  %v677_v58 = vpack.c.bf16 %v484_v52, %v483_v50  ;;  %v725_v59 = vadd.f32 %v724_v55, %v723_v53  ;;  %v749_v60 = vadd.f32 %v748_v56, %v747_v54  ;;  %v726_v61 = vpop.f32.mrb[6].mxu0  ;;  %v750_v62 = vpop.f32.mrb[6].mxu1 }
 0x126   :  { %v727_v63 = vpop.f32.mrb[7].mxu0  ;;  %v751_v0 = vpop.f32.mrb[7].mxu1 }
 0x127   :  { %658 = vst [vmem:[#allocation8] sm:$0xff] %v657_v57   ;;  %697 = vst [vmem:[#allocation8 + $0x20] sm:$0xff] %v677_v58   ;;  %v461_v1 = vadd.f32 %v725_v59, %v957_v35  ;;  %v469_v2 = vadd.f32 %v749_v60, %v957_v35  ;;  %v728_v3 = vadd.f32 %v727_v63, %v726_v61 }
 0x128   :  { %v752_v4 = vadd.f32 %v751_v0, %v750_v62 }
 0x129   :  { %v462_v5 = vadd.f32 %v728_v3, %v957_v35  ;;  %v477_v7 = vmax.f32 %v461_v1, 0.0  ;;  %v485_v8 = vmax.f32 %v469_v2, 0.0 }
 0x12a   :  { %v470_v6 = vadd.f32 %v752_v4, %v957_v35 }
 0x12b   :  { %v478_v9 = vmax.f32 %v462_v5, 0.0  ;;  %v729_v11 = vpop.f32.mrb[8].mxu0  ;;  %v753_v12 = vpop.f32.mrb[8].mxu1 }
 0x12c   :  { %v486_v10 = vmax.f32 %v470_v6, 0.0  ;;  %v730_v13 = vpop.f32.mrb[9].mxu0  ;;  %v754_v14 = vpop.f32.mrb[9].mxu1 }
 0x12d   :  { %v662_v15 = vpack.c.bf16 %v478_v9, %v477_v7  ;;  %v731_v17 = vadd.f32 %v730_v13, %v729_v11  ;;  %v755_v18 = vadd.f32 %v754_v14, %v753_v12  ;;  %v732_v19 = vpop.f32.mrb[10].mxu0  ;;  %v756_v20 = vpop.f32.mrb[10].mxu1 }
 0x12e   :  { %v682_v16 = vpack.c.bf16 %v486_v10, %v485_v8  ;;  %v733_v21 = vpop.f32.mrb[11].mxu0  ;;  %v757_v22 = vpop.f32.mrb[11].mxu1 }
 0x12f   :  { %694 = vst [vmem:[#allocation8 + $0x8] sm:$0xff] %v662_v15   ;;  %v463_v23 = vadd.f32 %v731_v17, %v957_v35  ;;  %v471_v24 = vadd.f32 %v755_v18, %v957_v35  ;;  %v734_v25 = vadd.f32 %v733_v21, %v732_v19  ;;  %v758_v26 = vadd.f32 %v757_v22, %v756_v20 }
 0x130   :  { %698 = vst [vmem:[#allocation8 + $0x28] sm:$0xff] %v682_v16  }
 0x131   :  { %v464_v27 = vadd.f32 %v734_v25, %v957_v35  ;;  %v472_v28 = vadd.f32 %v758_v26, %v957_v35  ;;  %v479_v29 = vmax.f32 %v463_v23, 0.0  ;;  %v487_v30 = vmax.f32 %v471_v24, 0.0 }
 0x133   :  { %v480_v31 = vmax.f32 %v464_v27, 0.0  ;;  %v488_v32 = vmax.f32 %v472_v28, 0.0  ;;  %v735_v33 = vpop.f32.mrb[12].mxu0  ;;  %v759_v34 = vpop.f32.mrb[12].mxu1 }
 0x134   :  { %v736_v36 = vpop.f32.mrb[13].mxu0  ;;  %v760_v37 = vpop.f32.mrb[13].mxu1 }
 0x135   :  { %v667_v38 = vpack.c.bf16 %v480_v31, %v479_v29  ;;  %v687_v39 = vpack.c.bf16 %v488_v32, %v487_v30  ;;  %v737_v40 = vadd.f32 %v736_v36, %v735_v33  ;;  %v761_v41 = vadd.f32 %v760_v37, %v759_v34  ;;  %v738_v42 = vpop.f32.mrb[14].mxu0  ;;  %v762_v43 = vpop.f32.mrb[14].mxu1 }
 0x136   :  { %v739_v44 = vpop.f32.mrb[15].mxu0  ;;  %v763_v45 = vpop.f32.mrb[15].mxu1 }
 0x137   :  { %695 = vst [vmem:[#allocation8 + $0x10] sm:$0xff] %v667_v38   ;;  %699 = vst [vmem:[#allocation8 + $0x30] sm:$0xff] %v687_v39   ;;  %v465_v46 = vadd.f32 %v737_v40, %v957_v35  ;;  %v473_v47 = vadd.f32 %v761_v41, %v957_v35  ;;  %v740_v48 = vadd.f32 %v739_v44, %v738_v42 }
 0x138   :  { %v764_v49 = vadd.f32 %v763_v45, %v762_v43 }
 0x139   :  { %v466_v50 = vadd.f32 %v740_v48, %v957_v35  ;;  %v481_v52 = vmax.f32 %v465_v46, 0.0  ;;  %v489_v53 = vmax.f32 %v473_v47, 0.0 }
 0x13a   :  { %v474_v51 = vadd.f32 %v764_v49, %v957_v35 }
 0x13b   :  { %v482_v54 = vmax.f32 %v466_v50, 0.0 }
 0x13c   :  { %v490_v55 = vmax.f32 %v474_v51, 0.0 }
 0x13d   :  { %v672_v56 = vpack.c.bf16 %v482_v54, %v481_v52 }
 0x13e   :  { %v692_v57 = vpack.c.bf16 %v490_v55, %v489_v53 }
 0x13f   :  { %696 = vst [vmem:[#allocation8 + $0x18] sm:$0xff] %v672_v56  }
 0x140   :  { %700 = vst [vmem:[#allocation8 + $0x38] sm:$0xff] %v692_v57  }
 0x141   :  { %883 = shalt.err (!%p880_p6)
}
 0x142   :  { %s884_s17 = scalar_lea.hbm %s993_s3, 1024 }
 0x143   :  { %p885_p7 = scmp.ne.s32.totalorder %s993_s3, %s884_s17  ;;  %p888_p8 = scmp.lt.u32.totalorder %s884_s17, %s993_s3 }
 0x145   :  { %p890_p9 = pnand %p888_p8, %p885_p7 }
 0x147   :  { %893 = shalt.err (!%p890_p9)
}
 0x148   :  { %582 = dma.vmem_to_hbm [thread:$0]  %s577_s13, 1024, %s993_s3, [#allocation5], %s904_s0, %s904_s0, %s905_s9  }
 0x149   :  { %898 = dma.done.wait [#allocation5], 1024  }
 0x14a   :  { %899 = vsyncadd [#allocation5], 4294966272 }
 0x14b   :  { %586 = vsyncpa [#allocation4], 1 }
 0x14c   :  { %587 = vsyncpa [#allocation7], 1 }
 0x14d   :  { %588 = vsyncpa [#allocation5], 1 }

</bundles_post_ra>
